<compile_context>
chip_gen: v5e
topology: v5e:2x2
jax: 0.10.0
libtpu: 0.0.40
codegen_flags: <defaults>
</compile_context>

<pallas_src>
import functools

import jax
import jax.numpy as jnp
import numpy as np
from jax.experimental import pallas as pl
from jax.experimental.pallas import tpu as pltpu

BOX_HEIGHT = 1000.0  # default dummy height used when boxes are BEV-only (2D)


def _round_up(x, m):
    return -(-int(x) // int(m)) * int(m)


def _auto_num_chunks():
    """Best-effort TensorCore count (2 on v7x, 1 on v5e/v6e).

    An extra chunk on a single-core chip only costs one extra tiny accumulator
    block + the O(K) JAX combine, so the fallback of 2 is harmless everywhere.
    """
    try:
        info = pltpu.get_tpu_info()
        for attr in ("num_cores", "core_count", "num_tensorcores", "tensorcore_count"):
            v = getattr(info, attr, None)
            if v:
                return max(1, int(v))
    except Exception:
        pass
    return 2


# --------------------------------------------------------------------------
# Pallas kernel.
#   pts_ref  : (4, TN)           lane-dense homogeneous points [x; y; z; 1]
#   mxyT_ref : (2*KP, 4)         rows 0..K-1 = x-row of box_T_sensor,
#                                rows KP..KP+K-1 = y-row (padded rows are 0)
#   half_ref : (2*KP, 1)         0.5*len (rows 0..) and 0.5*width (rows KP..)
#   acc_ref  : (KP, 128)         revisited output block; lane 0 = count,
#                                lane 1 = running zmax, lane 2 = running zmin
# --------------------------------------------------------------------------
def _fit_boxes_kernel(
    pts_ref, mxyT_ref, half_ref, acc_ref, *, box_height, precision, strip, kbox_pad, n_strips
):
    t = pl.program_id(1)

    @pl.when(t == 0)
    def _init():
        lane = jax.lax.broadcasted_iota(jnp.int32, (kbox_pad, 128), 1)
        acc_ref[...] = jnp.where(
            lane == 1, -box_height, jnp.where(lane == 2, box_height, 0.0)
        ).astype(jnp.float32)

    mxyT = mxyT_ref[...]   # (2*KP, 4)   tiny, loop-invariant (hoisted)
    half = half_ref[...]   # (2*KP, 1)

    def strip_body(s, carry):
        cnt, zmax, zmin = carry
        off = pl.multiple_of(s * strip, strip)
        p = pts_ref[:, pl.ds(off, strip)]                       # (4, strip), lane-dense
        # Single small MXU matmul: boxes along sublanes, points along lanes.
        xy = jnp.dot(mxyT, p, preferred_element_type=jnp.float32, precision=precision)
        inb = jnp.abs(xy) < half                                # (2*KP, strip)
        # x|y packing boundary is a multiple of 8 -> free sublane slices.
        in_box = inb[:kbox_pad, :] & inb[kbox_pad:, :]          # (KP, strip)
        pz = p[2:3, :]                                          # (1, strip) sensor z
        cnt = cnt + jnp.sum(in_box.astype(jnp.float32), axis=1, keepdims=True)
        zmax = jnp.maximum(
            zmax, jnp.max(jnp.where(in_box, pz, -box_height), axis=1, keepdims=True)
        )
        zmin = jnp.minimum(
            zmin, jnp.min(jnp.where(in_box, pz, box_height), axis=1, keepdims=True)
        )
        return cnt, zmax, zmin

    init = (
        jnp.zeros((kbox_pad, 1), jnp.float32),
        jnp.full((kbox_pad, 1), -box_height, jnp.float32),
        jnp.full((kbox_pad, 1), box_height, jnp.float32),
    )
    cnt, zmax, zmin = jax.lax.fori_loop(0, n_strips, strip_body, init, unroll=True)

    # Running stats live in lanes 0..2 of the resident output block.
    # (f32 count is exact up to 2^24 in-box points per box per chunk.)
    acc_ref[:, 0:1] = acc_ref[:, 0:1] + cnt
    acc_ref[:, 1:2] = jnp.maximum(acc_ref[:, 1:2], zmax)
    acc_ref[:, 2:3] = jnp.minimum(acc_ref[:, 2:3], zmin)


# --------------------------------------------------------------------------
# Box inputs: analytic inverse of the yaw+translation box poses, packed with
# boxes along sublanes ([x rows | y rows]).
# --------------------------------------------------------------------------
def _build_box_inputs(box_pos, box_rot, box_dims2d, kbox_pad):
    K = box_pos.shape[0]
    c = jnp.cos(box_rot[:, 0])
    s = jnp.sin(box_rot[:, 0])
    z = jnp.zeros_like(c)
    px, py = box_pos[:, 0], box_pos[:, 1]
    # box_T_sensor = inv([[R, t], [0, 1]]) with R = Rz(yaw), t = [px, py, 0]
    row_x = jnp.stack([c, s, z, -(c * px + s * py)], axis=-1)   # (K, 4)
    row_y = jnp.stack([-s, c, z, s * px - c * py], axis=-1)     # (K, 4)
    pad = ((0, kbox_pad - K), (0, 0))
    mxyT = jnp.concatenate([jnp.pad(row_x, pad), jnp.pad(row_y, pad)], axis=0)  # (2*KP, 4)
    half = jnp.concatenate(
        [jnp.pad(0.5 * box_dims2d[:, 0:1], pad), jnp.pad(0.5 * box_dims2d[:, 1:2], pad)],
        axis=0,
    )  # (2*KP, 1)
    return mxyT, half


def flow_cluster_detector_fit(
    pcl_full,            # (N, 3) point cloud (with ground) used for box fitting
    box_pos,             # (K, 2) BEV box centers (meters)
    box_dims2d,          # (K, 2) BEV box [len, width] (meters)
    box_rot,             # (K, 1) BEV box yaw
    *,
    min_num_pts_per_box=10,
    max_box_len_m=7.0,
    aspect_ratio_max=4.0,
    min_box_area_m2=0.35,
    min_box_volume_m3=0.5,
    box_height=BOX_HEIGHT,
    tile_n=4096,                 # points per grid step (clamped to the cloud size)
    strip=256,                   # in-kernel single-pass strip width (multiple of 128)
    num_parallel_chunks=None,    # None -> auto (2 TCs on v7x, else 1/fallback 2)
    # The torch reference transforms points in float64.  HIGHEST (f32-accurate
    # MXU) keeps in-box-count parity; pass jax.lax.Precision.HIGH (bf16_3x) or
    # DEFAULT for fewer MXU passes when bit-parity is not required.
    matmul_precision=jax.lax.Precision.HIGHEST,
    vmem_limit_bytes=None,       # per-tile VMEM is tiny now; only set if given
):
    N = pcl_full.shape[0]
    K = box_pos.shape[0]
    assert N > 0 and K > 0
    nc = _auto_num_chunks() if num_parallel_chunks is None else int(num_parallel_chunks)
    nc = max(1, nc)
    kbox_pad = max(8, _round_up(K, 8))

    # Clamp the tile so small clouds are not padded up by a huge factor.
    tile_n = int(tile_n)
    tile_n = max(256, min(tile_n, _round_up(-(-N // nc), 256)))
    strip = int(min(strip, tile_n))
    assert strip % 128 == 0 and tile_n % strip == 0

    xyz = pcl_full[:, :3].astype(jnp.float32)
    z0 = xyz[0, 2]  # original sensor z of point 0 (torch argmin-to-index-0 fallback)
    # Fold the |z| < box_height/2 test into the wrapper: such points can never
    # be in any box, so replace them with the far sentinel (kernel drops z_ok).
    far = jnp.abs(xyz[:, 2:3]) >= (0.5 * box_height)
    xyz = jnp.where(far, jnp.float32(1.0e6), xyz)

    chunk = tile_n * nc
    n_pad = (-N) % chunk
    if n_pad:
        xyz = jnp.concatenate([xyz, jnp.full((n_pad, 3), 1.0e6, jnp.float32)], axis=0)
    n_tot = N + n_pad
    tiles_per_chunk = n_tot // chunk
    # Lane-dense homogeneous points: (4, n_tot).
    homogT = jnp.concatenate([xyz.T, jnp.ones((1, n_tot), jnp.float32)], axis=0)

    mxyT, half = _build_box_inputs(
        box_pos.astype(jnp.float32),
        box_rot.astype(jnp.float32),
        box_dims2d.astype(jnp.float32),
        kbox_pad,
    )

    kernel = functools.partial(
        _fit_boxes_kernel,
        box_height=float(box_height),
        precision=matmul_precision,
        strip=strip,
        kbox_pad=kbox_pad,
        n_strips=tile_n // strip,
    )

    cp_kwargs = dict(dimension_semantics=("parallel", "arbitrary"))
    if vmem_limit_bytes is not None:
        cp_kwargs["vmem_limit_bytes"] = int(vmem_limit_bytes)

    acc = pl.pallas_call(
        kernel,
        out_shape=jax.ShapeDtypeStruct((nc * kbox_pad, 128), jnp.float32),
        grid_spec=pltpu.PrefetchScalarGridSpec(
            num_scalar_prefetch=0,
            grid=(nc, tiles_per_chunk),
            in_specs=[
                pl.BlockSpec((4, tile_n), lambda c, t: (0, c * tiles_per_chunk + t)),
                pl.BlockSpec((2 * kbox_pad, 4), lambda c, t: (0, 0)),
                pl.BlockSpec((2 * kbox_pad, 1), lambda c, t: (0, 0)),
            ],
            out_specs=pl.BlockSpec((kbox_pad, 128), lambda c, t: (c, 0)),
        ),
        compiler_params=pltpu.CompilerParams(**cp_kwargs),
    )(homogT, mxyT, half)

    # ---- cheap O(K) epilogue in plain JAX --------------------------------
    parts = acc.reshape(nc, kbox_pad, 128)
    cnt = jnp.sum(parts[:, :K, 0], axis=0)
    zmax = jnp.max(parts[:, :K, 1], axis=0)
    zmin = jnp.min(parts[:, :K, 2], axis=0)

    num_pts = cnt.astype(jnp.int32)
    fitted_h = jnp.clip(zmax - zmin, 1.0, 2.0)
    # Yaw-only poses => box-frame z == sensor z, so the sensor z of torch's
    # arg-min point equals zmin whenever the box holds >= 1 point.  For empty
    # boxes torch's argmin resolves to index 0 -> use the original z of point 0.
    z_at_min = jnp.where(num_pts > 0, zmin, z0)
    fitted_z = z_at_min + 0.5 * fitted_h

    l = box_dims2d[:, 0].astype(jnp.float32)
    w = box_dims2d[:, 1].astype(jnp.float32)
    valid = (
        (num_pts >= min_num_pts_per_box)
        & (l / jnp.maximum(w, 0.001) <= aspect_ratio_max)
        & (l <= max_box_len_m)
        & (l * w > min_box_area_m2)
        & (l * w * fitted_h > min_box_volume_m3)
    )
    return num_pts, fitted_z, fitted_h, valid


def flow_cluster_detector_forward(pcl_full, box_pos, box_dims2d, box_rot, **fit_kwargs):
    """Mirror of FlowClusterDetector.forward()'s box-fitting / filtering tail.

    # TODO(synk): DBSCAN clustering of dynamic BEV cells, skimage regionprops
    # (centroid / orientation / axis lengths), mark_boundaries visualization,
    # tensorboard logging and the KabschDecoder velocity refinement have no
    # clean Pallas equivalent; the BEV boxes are assumed to be given here.
    """
    num_pts, fitted_z, fitted_h, valid = flow_cluster_detector_fit(
        pcl_full, box_pos, box_dims2d, box_rot, **fit_kwargs
    )
    dims3 = jnp.concatenate([box_dims2d, fitted_h[:, None]], axis=-1)
    pos3 = jnp.concatenate([box_pos, fitted_z[:, None]], axis=-1)
    return {
        "pos": pos3,
        "dims": dims3,
        "rot": box_rot,
        "probs": jnp.ones_like(box_rot),
        "valid": valid,
        "num_pts_in_box": num_pts,
    }


# --------------------------------------------------------------------------
# Pure-JAX reference (torch semantics) for correctness checking.
# --------------------------------------------------------------------------
def _reference(pcl_full, box_pos, box_dims2d, box_rot, box_height=BOX_HEIGHT):
    N = pcl_full.shape[0]
    K = box_pos.shape[0]
    c = jnp.cos(box_rot[:, 0])
    s = jnp.sin(box_rot[:, 0])
    z = jnp.zeros_like(c)
    o = jnp.ones_like(c)
    px, py = box_pos[:, 0], box_pos[:, 1]
    M = jnp.stack(
        [
            jnp.stack([c, s, z, -(c * px + s * py)], axis=-1),
            jnp.stack([-s, c, z, s * px - c * py], axis=-1),
            jnp.stack([z, z, o, z], axis=-1),
        ],
        axis=-2,
    )  # (K, 3, 4) = box_T_sensor[:3]
    homog = jnp.concatenate(
        [pcl_full[:, :3].astype(jnp.float32), jnp.ones((N, 1), jnp.float32)], axis=-1
    )
    pts_in_box = jnp.einsum("kij,nj->nki", M, homog, precision=jax.lax.Precision.HIGHEST)
    dims3 = jnp.concatenate(
        [box_dims2d, jnp.full((K, 1), box_height, box_dims2d.dtype)], axis=-1
    )
    in_box = jnp.all(jnp.abs(pts_in_box) < 0.5 * dims3[None], axis=-1)
    zc = pts_in_box[..., 2]
    zmax = jnp.max(jnp.where(in_box, zc, -box_height), axis=0)
    z_for_min = jnp.where(in_box, zc, box_height)
    zmin = jnp.min(z_for_min, axis=0)
    zmin_idx = jnp.argmin(z_for_min, axis=0)
    h = jnp.clip(zmax - zmin, 1.0, 2.0)
    fz = homog[zmin_idx, 2] + 0.5 * h
    n = jnp.sum(in_box, axis=0).astype(jnp.int32)
    l, w = box_dims2d[:, 0], box_dims2d[:, 1]
    valid = (
        (n >= 10)
        & (l / jnp.maximum(w, 0.001) <= 4.0)
        & (l <= 7.0)
        & (l * w > 0.35)
        & (l * w * h > 0.5)
    )
    return n, fz, h, valid


def _check(num_pts, fz, h, valid, ref, check_valid=True):
    n_ref, z_ref, h_ref, v_ref = ref
    np.testing.assert_allclose(np.asarray(num_pts), np.asarray(n_ref), rtol=0, atol=0)
    np.testing.assert_allclose(np.asarray(h), np.asarray(h_ref), rtol=1e-4, atol=1e-4)
    np.testing.assert_allclose(np.asarray(fz), np.asarray(z_ref), rtol=1e-4, atol=1e-4)
    if check_valid:
        np.testing.assert_array_equal(np.asarray(valid), np.asarray(v_ref))


if __name__ == "__main__":
    key = jax.random.PRNGKey(0)
    k1, k2, k3, k4, k5, k6, k7, k8, k9, k10 = jax.random.split(key, 10)

    # Scene 1: small synthetic scene, K = 6 clusters.
    N, K = 3000, 6
    pcl_xy = jax.random.uniform(k1, (N, 2), minval=-10.0, maxval=10.0)
    pcl_z = jax.random.uniform(k2, (N, 1), minval=-0.5, maxval=2.0)
    pcl_full = jnp.concatenate([pcl_xy, pcl_z], axis=-1)  # (N, 3)

    box_pos = jax.random.uniform(k3, (K, 2), minval=-8.0, maxval=8.0)
    box_rot = jax.random.uniform(k4, (K, 1), minval=-3.1, maxval=3.1)
    box_len = jax.random.uniform(k5, (K,), minval=2.0, maxval=6.0)
    box_width = jax.random.uniform(k6, (K,), minval=1.0, maxval=2.5)
    box_dims2d = jnp.stack([box_len, box_width], axis=-1)

    ref1 = _reference(pcl_full, box_pos, box_dims2d, box_rot)

    # 1) small-tile config: exercises multi-tile accumulation + 2-chunk combine
    boxes = flow_cluster_detector_forward(
        pcl_full, box_pos, box_dims2d, box_rot, tile_n=512, num_parallel_chunks=2
    )
    jax.block_until_ready(boxes)
    _check(
        boxes["num_pts_in_box"], boxes["pos"][:, 2], boxes["dims"][:, 2], boxes["valid"], ref1
    )

    # 2) default (production) config: auto chunk count, clamped tile, strip loop
    n2, z2, h2, v2 = flow_cluster_detector_fit(pcl_full, box_pos, box_dims2d, box_rot)
    jax.block_until_ready((n2, z2, h2, v2))
    _check(n2, z2, h2, v2, ref1)

    # Scene 2: more clusters (K = 20) to exercise kbox_pad > 8 (24 sublanes).
    K2 = 20
    box_pos2 = jax.random.uniform(k7, (K2, 2), minval=-8.0, maxval=8.0)
    box_rot2 = jax.random.uniform(k8, (K2, 1), minval=-3.1, maxval=3.1)
    box_len2 = jax.random.uniform(k9, (K2,), minval=1.0, maxval=6.5)
    box_width2 = jax.random.uniform(k10, (K2,), minval=0.6, maxval=2.5)
    box_dims2d2 = jnp.stack([box_len2, box_width2], axis=-1)

    ref2 = _reference(pcl_full, box_pos2, box_dims2d2, box_rot2)
    n3, z3, h3, v3 = flow_cluster_detector_fit(pcl_full, box_pos2, box_dims2d2, box_rot2)
    jax.block_until_ready((n3, z3, h3, v3))
    _check(n3, z3, h3, v3, ref2)

    print("KERNEL_OK")
</pallas_src>

<mosaic_0001>
module attributes {stable_mosaic.version = 11 : i64} {
  func.func @_fit_boxes_kernel(%arg0: i32, %arg1: i32, %arg2: memref<4x512xf32, #tpu.memory_space<vmem>>, %arg3: memref<16x4xf32, #tpu.memory_space<vmem>>, %arg4: memref<16x1xf32, #tpu.memory_space<vmem>>, %arg5: memref<8x128xf32, #tpu.memory_space<vmem>>) attributes {dimension_semantics = [#tpu.dimension_semantics<parallel>, #tpu.dimension_semantics<arbitrary>], iteration_bounds = array<i64: 2, 3>, scalar_prefetch = 0 : i64, scratch_operands = 0 : i64, tpu.core_type = #tpu.core_type<tc>, window_params = [{transform_indices = @transform_0, window_bounds = array<i64: 4, 512>}, {pipeline_mode = #tpu.pipeline_mode<synchronous>, transform_indices = @transform_1, window_bounds = array<i64: 16, 4>}, {pipeline_mode = #tpu.pipeline_mode<synchronous>, transform_indices = @transform_2, window_bounds = array<i64: 16, 1>}, {transform_indices = @transform_3, window_bounds = array<i64: 8, 128>}]} {
    %c0_i32 = arith.constant 0 : i32
    %0 = arith.cmpi eq, %arg1, %c0_i32 : i32
    %1 = arith.extui %0 : i1 to i32
    %c0_i32_0 = arith.constant 0 : i32
    %2 = arith.cmpi ne, %1, %c0_i32_0 : i32
    scf.if %2 {
      %79 = tpu.iota {dimensions = array<i32: 1>} : vector<8x128xi32>
      %c1_i32_32 = arith.constant 1 : i32
      %80 = vector.broadcast %c1_i32_32 : i32 to vector<8x128xi32>
      %81 = arith.cmpi eq, %79, %80 : vector<8x128xi32>
      %c2_i32_33 = arith.constant 2 : i32
      %82 = vector.broadcast %c2_i32_33 : i32 to vector<8x128xi32>
      %83 = arith.cmpi eq, %79, %82 : vector<8x128xi32>
      %cst_34 = arith.constant 1.000000e+03 : f32
      %cst_35 = arith.constant 0.000000e+00 : f32
      %84 = vector.broadcast %cst_34 : f32 to vector<8x128xf32>
      %85 = vector.broadcast %cst_35 : f32 to vector<8x128xf32>
      %86 = arith.select %83, %84, %85 : vector<8x128xi1>, vector<8x128xf32>
      %cst_36 = arith.constant -1.000000e+03 : f32
      %87 = vector.broadcast %cst_36 : f32 to vector<8x128xf32>
      %88 = arith.select %81, %87, %86 : vector<8x128xi1>, vector<8x128xf32>
      %c0_37 = arith.constant 0 : index
      %c0_38 = arith.constant 0 : index
      %89 = vector.load %arg5[%c0_37, %c0_38] : memref<8x128xf32, #tpu.memory_space<vmem>>, vector<8x128xf32>
      tpu.vector_store %arg5[%c0_37, %c0_38], %88 {strides = array<i32>} : memref<8x128xf32, #tpu.memory_space<vmem>>, vector<8x128xf32>,
    } else {
    }
    %c0 = arith.constant 0 : index
    %c0_1 = arith.constant 0 : index
    %3 = vector.load %arg3[%c0, %c0_1] : memref<16x4xf32, #tpu.memory_space<vmem>>, vector<16x4xf32>
    %c0_2 = arith.constant 0 : index
    %c0_3 = arith.constant 0 : index
    %4 = vector.load %arg4[%c0_2, %c0_3] : memref<16x1xf32, #tpu.memory_space<vmem>>, vector<16x1xf32>
    %cst = arith.constant 0.000000e+00 : f32
    %5 = vector.broadcast %cst : f32 to vector<8x1xf32>
    %cst_4 = arith.constant -1.000000e+03 : f32
    %6 = vector.broadcast %cst_4 : f32 to vector<8x1xf32>
    %cst_5 = arith.constant 1.000000e+03 : f32
    %7 = vector.broadcast %cst_5 : f32 to vector<8x1xf32>
    %c0_i32_6 = arith.constant 0 : i32
    %c256_i32 = arith.constant 256 : i32
    %8 = arith.muli %c0_i32_6, %c256_i32 : i32
    %9 = tpu.assume_multiple %8, 256 : i32
    %c0_7 = arith.constant 0 : index
    %10 = arith.index_cast %9 : i32 to index
    %11 = vector.load %arg2[%c0_7, %10] : memref<4x512xf32, #tpu.memory_space<vmem>>, vector<4x256xf32>
    %cst_8 = arith.constant dense<0.000000e+00> : vector<16x256xf32>
    %12 = tpu.matmul %3, %11, %cst_8 {dimension_numbers = #tpu.dot_dimension_numbers<[1], [0], [0], [1], [0, 0, 1, 1], [], []>, precision = #tpu.contract_precision<fp32>} : vector<16x4xf32>, vector<4x256xf32>, vector<16x256xf32> -> vector<16x256xf32>
    %13 = math.absf %12 : vector<16x256xf32>
    %14 = vector.broadcast %4 : vector<16x1xf32> to vector<16x256xf32>
    %15 = arith.cmpf olt, %13, %14 : vector<16x256xf32>
    %16 = vector.extract_strided_slice %15 {offsets = [0, 0], sizes = [8, 256], strides = [1, 1]} : vector<16x256xi1> to vector<8x256xi1>
    %17 = vector.extract_strided_slice %15 {offsets = [8, 0], sizes = [8, 256], strides = [1, 1]} : vector<16x256xi1> to vector<8x256xi1>
    %18 = arith.andi %16, %17 : vector<8x256xi1>
    %19 = vector.extract_strided_slice %11 {offsets = [2, 0], sizes = [1, 256], strides = [1, 1]} : vector<4x256xf32> to vector<1x256xf32>
    %20 = arith.extui %18 : vector<8x256xi1> to vector<8x256xi32>
    %21 = arith.sitofp %20 : vector<8x256xi32> to vector<8x256xf32>
    %cst_9 = arith.constant dense<0.000000e+00> : vector<8xf32>
    %22 = vector.multi_reduction <add>, %21, %cst_9 [1] : vector<8x256xf32> to vector<8xf32>
    %23 = vector.shape_cast %22 : vector<8xf32> to vector<8x1xf32>
    %24 = arith.addf %5, %23 : vector<8x1xf32>
    %cst_10 = arith.constant -1.000000e+03 : f32
    %25 = vector.shape_cast %19 : vector<1x256xf32> to vector<1x256xf32>
    %26 = vector.broadcast %25 : vector<1x256xf32> to vector<8x256xf32>
    %27 = vector.broadcast %cst_10 : f32 to vector<8x256xf32>
    %28 = arith.select %18, %26, %27 : vector<8x256xi1>, vector<8x256xf32>
    %cst_11 = arith.constant dense<0xFF800000> : vector<8xf32>
    %29 = vector.multi_reduction <maximumf>, %28, %cst_11 [1] : vector<8x256xf32> to vector<8xf32>
    %30 = vector.shape_cast %29 : vector<8xf32> to vector<8x1xf32>
    %31 = arith.maximumf %6, %30 : vector<8x1xf32>
    %cst_12 = arith.constant 1.000000e+03 : f32
    %32 = vector.shape_cast %19 : vector<1x256xf32> to vector<1x256xf32>
    %33 = vector.broadcast %32 : vector<1x256xf32> to vector<8x256xf32>
    %34 = vector.broadcast %cst_12 : f32 to vector<8x256xf32>
    %35 = arith.select %18, %33, %34 : vector<8x256xi1>, vector<8x256xf32>
    %cst_13 = arith.constant dense<0x7F800000> : vector<8xf32>
    %36 = vector.multi_reduction <minimumf>, %35, %cst_13 [1] : vector<8x256xf32> to vector<8xf32>
    %37 = vector.shape_cast %36 : vector<8xf32> to vector<8x1xf32>
    %38 = arith.minimumf %7, %37 : vector<8x1xf32>
    %c1_i32 = arith.constant 1 : i32
    %c256_i32_14 = arith.constant 256 : i32
    %39 = arith.muli %c1_i32, %c256_i32_14 : i32
    %40 = tpu.assume_multiple %39, 256 : i32
    %c0_15 = arith.constant 0 : index
    %41 = arith.index_cast %40 : i32 to index
    %42 = vector.load %arg2[%c0_15, %41] : memref<4x512xf32, #tpu.memory_space<vmem>>, vector<4x256xf32>
    %cst_16 = arith.constant dense<0.000000e+00> : vector<16x256xf32>
    %43 = tpu.matmul %3, %42, %cst_16 {dimension_numbers = #tpu.dot_dimension_numbers<[1], [0], [0], [1], [0, 0, 1, 1], [], []>, precision = #tpu.contract_precision<fp32>} : vector<16x4xf32>, vector<4x256xf32>, vector<16x256xf32> -> vector<16x256xf32>
    %44 = math.absf %43 : vector<16x256xf32>
    %45 = vector.broadcast %4 : vector<16x1xf32> to vector<16x256xf32>
    %46 = arith.cmpf olt, %44, %45 : vector<16x256xf32>
    %47 = vector.extract_strided_slice %46 {offsets = [0, 0], sizes = [8, 256], strides = [1, 1]} : vector<16x256xi1> to vector<8x256xi1>
    %48 = vector.extract_strided_slice %46 {offsets = [8, 0], sizes = [8, 256], strides = [1, 1]} : vector<16x256xi1> to vector<8x256xi1>
    %49 = arith.andi %47, %48 : vector<8x256xi1>
    %50 = vector.extract_strided_slice %42 {offsets = [2, 0], sizes = [1, 256], strides = [1, 1]} : vector<4x256xf32> to vector<1x256xf32>
    %51 = arith.extui %49 : vector<8x256xi1> to vector<8x256xi32>
    %52 = arith.sitofp %51 : vector<8x256xi32> to vector<8x256xf32>
    %cst_17 = arith.constant dense<0.000000e+00> : vector<8xf32>
    %53 = vector.multi_reduction <add>, %52, %cst_17 [1] : vector<8x256xf32> to vector<8xf32>
    %54 = vector.shape_cast %53 : vector<8xf32> to vector<8x1xf32>
    %55 = arith.addf %24, %54 : vector<8x1xf32>
    %cst_18 = arith.constant -1.000000e+03 : f32
    %56 = vector.shape_cast %50 : vector<1x256xf32> to vector<1x256xf32>
    %57 = vector.broadcast %56 : vector<1x256xf32> to vector<8x256xf32>
    %58 = vector.broadcast %cst_18 : f32 to vector<8x256xf32>
    %59 = arith.select %49, %57, %58 : vector<8x256xi1>, vector<8x256xf32>
    %cst_19 = arith.constant dense<0xFF800000> : vector<8xf32>
    %60 = vector.multi_reduction <maximumf>, %59, %cst_19 [1] : vector<8x256xf32> to vector<8xf32>
    %61 = vector.shape_cast %60 : vector<8xf32> to vector<8x1xf32>
    %62 = arith.maximumf %31, %61 : vector<8x1xf32>
    %cst_20 = arith.constant 1.000000e+03 : f32
    %63 = vector.shape_cast %50 : vector<1x256xf32> to vector<1x256xf32>
    %64 = vector.broadcast %63 : vector<1x256xf32> to vector<8x256xf32>
    %65 = vector.broadcast %cst_20 : f32 to vector<8x256xf32>
    %66 = arith.select %49, %64, %65 : vector<8x256xi1>, vector<8x256xf32>
    %cst_21 = arith.constant dense<0x7F800000> : vector<8xf32>
    %67 = vector.multi_reduction <minimumf>, %66, %cst_21 [1] : vector<8x256xf32> to vector<8xf32>
    %68 = vector.shape_cast %67 : vector<8xf32> to vector<8x1xf32>
    %69 = arith.minimumf %38, %68 : vector<8x1xf32>
    %c2_i32 = arith.constant 2 : i32
    %c0_22 = arith.constant 0 : index
    %c0_23 = arith.constant 0 : index
    %70 = vector.load %arg5[%c0_22, %c0_23] : memref<8x128xf32, #tpu.memory_space<vmem>>, vector<8x1xf32>
    %71 = arith.addf %70, %55 : vector<8x1xf32>
    %c0_24 = arith.constant 0 : index
    %c0_25 = arith.constant 0 : index
    %72 = vector.load %arg5[%c0_24, %c0_25] : memref<8x128xf32, #tpu.memory_space<vmem>>, vector<8x1xf32>
    tpu.vector_store %arg5[%c0_24, %c0_25], %71 {strides = array<i32>} : memref<8x128xf32, #tpu.memory_space<vmem>>, vector<8x1xf32>,
    %c0_26 = arith.constant 0 : index
    %c1 = arith.constant 1 : index
    %73 = vector.load %arg5[%c0_26, %c1] : memref<8x128xf32, #tpu.memory_space<vmem>>, vector<8x1xf32>
    %74 = arith.maximumf %73, %62 : vector<8x1xf32>
    %c0_27 = arith.constant 0 : index
    %c1_28 = arith.constant 1 : index
    %75 = vector.load %arg5[%c0_27, %c1_28] : memref<8x128xf32, #tpu.memory_space<vmem>>, vector<8x1xf32>
    tpu.vector_store %arg5[%c0_27, %c1_28], %74 {strides = array<i32>} : memref<8x128xf32, #tpu.memory_space<vmem>>, vector<8x1xf32>,
    %c0_29 = arith.constant 0 : index
    %c2 = arith.constant 2 : index
    %76 = vector.load %arg5[%c0_29, %c2] : memref<8x128xf32, #tpu.memory_space<vmem>>, vector<8x1xf32>
    %77 = arith.minimumf %76, %69 : vector<8x1xf32>
    %c0_30 = arith.constant 0 : index
    %c2_31 = arith.constant 2 : index
    %78 = vector.load %arg5[%c0_30, %c2_31] : memref<8x128xf32, #tpu.memory_space<vmem>>, vector<8x1xf32>
    tpu.vector_store %arg5[%c0_30, %c2_31], %77 {strides = array<i32>} : memref<8x128xf32, #tpu.memory_space<vmem>>, vector<8x1xf32>,
    return
  }
  func.func @transform_0(%arg0: i32, %arg1: i32) -> (i32, i32) {
    %c3_i32 = arith.constant 3 : i32
    %0 = arith.muli %arg0, %c3_i32 : i32
    %1 = arith.addi %0, %arg1 : i32
    %c0_i32 = arith.constant 0 : i32
    %c0_i32_0 = arith.constant 0 : i32
    return %c0_i32, %1 : i32, i32
  }
  func.func @transform_1(%arg0: i32, %arg1: i32) -> (i32, i32) {
    %c0_i32 = arith.constant 0 : i32
    %c0_i32_0 = arith.constant 0 : i32
    %c0_i32_1 = arith.constant 0 : i32
    return %c0_i32, %c0_i32_0 : i32, i32
  }
  func.func @transform_2(%arg0: i32, %arg1: i32) -> (i32, i32) {
    %c0_i32 = arith.constant 0 : i32
    %c0_i32_0 = arith.constant 0 : i32
    %c0_i32_1 = arith.constant 0 : i32
    return %c0_i32, %c0_i32_0 : i32, i32
  }
  func.func @transform_3(%arg0: i32, %arg1: i32) -> (i32, i32) {
    %c0_i32 = arith.constant 0 : i32
    %c0_i32_0 = arith.constant 0 : i32
    return %arg0, %c0_i32 : i32, i32
  }
}

</mosaic_0001>

<bundles_post_ra>
// kernel: tpu_custom_call.1
= control target key start
LH: loop header
LB: loop body
LE: loop exit
PB: predicated region body
PF: predicated region fallthrough
CT: control target
= control target key end

     0   :  { %8 = vsyncpa [#allocation3], 0  ;;  %s1767_s0 = inlined_call_operand.hbm [shape: f32[4,3072], index: 0, kind: input, shape index: {}]   ;;  %s1768_s1 = inlined_call_operand.vmem [shape: f32[16,4], index: 1, kind: input, shape index: {}]   ;;  %s1769_s2 = inlined_call_operand.vmem [shape: f32[16,1], index: 2, kind: input, shape index: {}]   ;;  %s1770_s3 = inlined_call_operand.hbm [shape: f32[16,128], index: 3, kind: output, shape index: {}]  }
   0x1   :  { %10 = vsyncpa [#allocation3 + $0x1], 0 }
   0x2   :  { %11 = vsyncpa [#allocation4], 0 }
   0x3   :  { %13 = vsyncpa [#allocation4 + $0x1], 0  ;;  %s1457_s12 = smov 0   ;;  %s1459_s13 = smov 0  }
   0x4   :  { %s1461_s14 = smov 0   ;;  %s1463_s15 = smov 0  }
   0x5   :  { %s1465_s16 = smov 0   ;;  %s1467_s17 = smov 0  }
   0x6   :  { %s1469_s18 = smov 0   ;;  %s1471_s19 = smov 0  }
   0x7   :  { %s1473_s20 = smov 0   ;;  %s1475_s21 = smov 0  }
   0x8   :  { %s1477_s22 = smov 0  }
   0x9 LB: > { %1774 = sst [smem:[#allocation8_spill]] %s1428_s21  ;;  %s1153_s23 = sadd.s32 4294967295, %s1432_s22   ;;  %s1432_s22 = sphi %s1477_s22, %s19_s22   ;;  %s1428_s21 = sphi %s1475_s21, %s1786_s21   ;;  %s1424_s20 = sphi %s1473_s20, %s1794_s20   ;;  %s1420_s19 = sphi %s1471_s19, %s1784_s19   ;;  %s1416_s18 = sphi %s1469_s18, %s1793_s18   ;;  %s1412_s17 = sphi %s1467_s17, %s1792_s17   ;;  %s1408_s16 = sphi %s1465_s16, %s1791_s16   ;;  %s1404_s15 = sphi %s1463_s15, %s1790_s15   ;;  %s1400_s14 = sphi %s1461_s14, %s1789_s14   ;;  %s1396_s13 = sphi %s1459_s13, %s1788_s13   ;;  %s1392_s12 = sphi %s1457_s12, %s1787_s12  }
   0xa   : > { %s1154_s24 = sadd.s32 4294967294, %s1432_s22   ;;  %s28_s25 = sadd.s32 1, %s1424_s20 }
   0xb   : > { %s31_s26 = sadd.s32 1, %s1428_s21  ;;  %p29_p0 = scmp.ge.s32.totalorder %s28_s25, 3 }
   0xc   : > { %s35_s27 = smul.u32 3, %s1428_s21  ;;  %s42_s28 = sadd.s32 1, %s1412_s17 }
   0xd   : > { %p49_p1 = scmp.ne.s32.totalorder %s1412_s17, %s1408_s16  ;;  %s1796_s25 = smov (%p29_p0, %s28_s25), 0 }
   0xe   : > { %1775 = sst [smem:[#allocation9_spill]] %s1796_s25  ;;  %s1798_s26 = smov (!%p29_p0, %s31_s26), %s1428_s21 }
   0xf   : > { %s36_s29 = sadd.s32 %s1424_s20, %s35_s27  ;;  %p50_p2 = scmp.eq.s32.totalorder %s1432_s22, 0 }
  0x10   : > { %p33_p3 = scmp.ge.s32.totalorder %s1798_s26, 2  ;;  %p55_p4 = scmp.ne.s32.totalorder %s1408_s16, %s1404_s15 }
  0x11   : > { %p1524_p5 = por %p50_p2, %p49_p1  ;;  %p56_p6 = scmp.eq.s32.totalorder %s1153_s23, 0 }
  0x12   : > { %s1800_s26 = smov (%p33_p3, %s1798_s26), 0  ;;  %s110_s5 = sadd.s32 1, %s1400_s14 }
  0x13   : > { %1777 = sst [smem:[#allocation10_spill]] %s1800_s26  ;;  %p1530_p7 = por %p56_p6, %p55_p4 }
  0x14   : > { %s37_s6 = smul.u32 3, %s1800_s26  ;;  %s107_s7 = ssub.s32 %s1428_s21, %s1800_s26 }
  0x15   : > { %p108_p8 = scmp.eq.s32.totalorder %s107_s7, 0  ;;  %p120_p9 = scmp.ne.s32.totalorder %s1400_s14, %s1396_s13 }
  0x16   : > { %s38_s8 = sadd.s32 %s37_s6, %s1796_s25  ;;  %p121_p10 = scmp.eq.s32.totalorder %s1153_s23, 5 }
  0x17   : > { %s39_s9 = ssub.s32 %s36_s29, %s38_s8  ;;  %p126_p11 = scmp.ne.s32.totalorder %s1396_s13, %s1392_s12 }
  0x18   : > { %p40_p12 = scmp.eq.s32.totalorder %s39_s9, 0  ;;  %p1543_p13 = por %p121_p10, %p120_p9 }
  0x19   : > { %s1548_s11 = scalar_select %p108_p8, %s1400_s14, %s110_s5  }
  0x1a   : > { %s1551_s15 = scalar_select %p40_p12, %s1412_s17, %s42_s28  }
  0x1b   : > { %p127_p0 = scmp.eq.s32.totalorder %s1154_s24, 5  ;;  %p1186_p1 = scmp.lt.s32.totalorder %s1432_s22, 6 }
  0x1c   : > { %s153_s27 = sand.u32 1, %s1412_s17   ;;  %s1173_s7 = sshll.u32 %s36_s29, 4 }
  0x1d   : > { %p1557_p2 = por %p127_p0, %p126_p11  ;;  %s1157_s6 = sshll.u32 %s153_s27, 4 }
  0x1e   : > { %s164_s26 = scalar_lea.hbm %s1767_s0, %s1173_s7  ;;  %s157_s5 = scalar_lea.vmem [#allocation2], %s1157_s6 }
  0x1f   : > { %s166_s25 = sshll.u32 %s164_s26, 4  ;;  %s168_s21 = sshll.u32 %s157_s5, 4  ;;  %s167_s25 = int_to_ptr.hbm [resolvable:$true] %s166_s25  ;;  %s169_s21 = int_to_ptr.vmem [resolvable:$true] %s168_s21 }
  0x20   : > { %p1179_p3 = pnand %p1186_p1, %p1524_p5  ;;  %p1160_p4 = scmp.ge.s32.totalorder %s1432_s22, 1 }
  0x21   : > { %p173_p6 = scmp.lt.s32.totalorder %s1432_s22, 7  ;;  %s154_s24 = scalar_lea.sflag [#allocation3], %s153_s27 }
  0x22   : > { %1181 = dma.hbm_to_vmem [thread:$0]  (!%p1179_p3), %s167_s25, 256, %s169_s21, %s154_s24  }
  0x23   : > { %p174_p8 = pnand %p1160_p4, %p173_p6 }
  0x24   : > { %s179_s28 = sand.u32 (!%p174_p8), 1, %s1408_s16  }
  0x25   : > { %177 = sbr.rel (%p174_p8) target bundleno = 449 (0x1c1), region = 32  ;;  %s1569_s29 = sshll.u32 (!%p174_p8), %s179_s28, 4 }
  0x26   : > { %s180_s7 = scalar_lea.sflag (!%p174_p8), [#allocation3], %s179_s28  ;;  %s183_s26 = scalar_lea.vmem (!%p174_p8), [#allocation2], %s1569_s29 }
  0x2a   : > { %1383 = dma.done.wait (%p1530_p7), %s180_s7, 256  }
  0x2b   : > { %1385 = vsyncadd (%p1530_p7), %s180_s7, 4294967040  ;;  %s204_s30 = sand.u32 1, %s1396_s13   ;;  %p1163_p5 = scmp.ne.s32.totalorder %s1416_s18, 0 }
  0x2c   : > { %s1162_s21 = sshll.u32 %s204_s30, 3 }
  0x2d   : > { %s1579_s25 = scalar_lea.vmem [#allocation5], %s1162_s21  ;;  %213 = sbr.rel (%p1163_p5) target bundleno = 58 (0x3a), region = 40 }
  0x32   : > { %v214_v0 = vlaneseq  ;;  %v1434_v2 = vmov 0.0  }
  0x34   : > { %v215_v1 = vand.u32 127, %v214_v0 }
  0x36   : > { %vm216_vm0 = vcmp.eq.s32.totalorder %v215_v1, 1  ;;  %vm217_vm1 = vcmp.eq.s32.totalorder %v215_v1, 2 }
  0x37   : > { %v218_v3 = vsel %vm217_vm1, 1000.0, %v1434_v2 }
  0x38   : > { %v219_v4 = vsel %vm216_vm0, -1000.0, %v218_v3 }
  0x39   : > { %220 = vst [vmem:[%s1579_s25] sm:$0xff] %v219_v4 }
  0x3a PF: > { %v1583_v5 = vld [vmem:[%s183_s26] sm:$0xff]  ;;  %v221_v6 = vld [vmem:[%s1768_s1] sm:$0xff]  ;;  %vm230_vm2 = vcmask 31744   ;;  %vm237_vm3 = vcmask 1043456   ;;  %v1435_v39 = vmov 0   ;;  %vm1044_vm0 = vcmask 7168  }
  0x3b   : > { %227 = vst [vmem:[#allocation1] ss:$2 sm:$0xff] %v1583_v5  ;;  %v232_v7 = vsel %vm230_vm2, %v221_v6, 0  ;;  %v222_v8 = vld [vmem:[%s1768_s1 + $0x8] sm:$0xff]  ;;  %v1605_v15 = vld [vmem:[%s183_s26 + $0x8] sm:$0xff]  ;;  %1279 = vset.pattern.permute.xlu0 %v1435_v39  ;;  %v625_v39 = vperm.slane %v1583_v5, 6 }
  0x3c   : > { %v1592_v9 = vand.u32 4294901760, %v232_v7  ;;  %v235_v10 = vsel %vm230_vm2, %v222_v8, 0  ;;  %v223_v33 = vld [vmem:[%s1769_s2] sm:$0xff]  ;;  %v224_v41 = vld [vmem:[%s1769_s2 + $0x8] sm:$0xff]  ;;  %vm1048_vm1 = vcmask 15368   ;;  %s1170_s28 = sshll.u32 %s1420_s19, 3 }
  0x3d   : > { %v1594_v11 = vand.u32 4294901760, %v235_v10  ;;  %602 = vperm.xlu0 %1279, %v223_v33   ;;  %s1065_s26 = scalar_lea.hbm %s1770_s3, %s1170_s28  ;;  %s1067_s21 = sshll.u32 %s1579_s25, 4  ;;  %vm1052_vm2 = vcmask 23568   ;;  %s1068_s21 = int_to_ptr.vmem [resolvable:$true] %s1067_s21 }
  0x3e   : > { %v1597_v12 = vsub.f32 %v232_v7, %v1592_v9  ;;  %s1069_s4 = sshll.u32 %s1065_s26, 4  ;;  %s1055_s19 = scalar_lea.sflag [#allocation4], %s204_s30  ;;  %s1070_s4 = int_to_ptr.hbm [resolvable:$true] %s1069_s4 }
  0x3f   : > { %v1600_v13 = vsub.f32 %v235_v10, %v1594_v11  ;;  %s1324_s27 = sshra.s32 %s1070_s4, 4  ;;  %s1330_s9 = scalar_lea.hbm %s1770_s3, 16  ;;  %s1325_s27 = int_to_ptr.hbm [resolvable:$true] %s1324_s27 }
  0x40   : > { %v1603_v14 = vand.u32 4294901760, %v1597_v12  ;;  %s1326_s18 = scalar_lea.hbm %s1325_s27, 8  ;;  %p1331_p11 = scmp.lt.s32.totalorder %s1325_s27, %s1770_s3 }
  0x41   : > { %v1613_v21 = vand.u32 4294901760, %v1600_v13  ;;  %p1327_p7 = scmp.ne.s32.totalorder %s1325_s27, %s1326_s18  ;;  %p1332_p12 = scmp.lt.s32.totalorder %s1330_s9, %s1326_s18 }
  0x42   : > { %v228_v16 = vld.sshfl [vmem:[#allocation1] sm:$0xff pattern:$0x75316420]  ;;  %v262_v17 = vsub.f32 %v1597_v12, %v1603_v14  ;;  %v229_v18 = vld.sshfl [vmem:[#allocation1 + $0x8] sm:$0xff pattern:$0x75316420] }
  0x43   : > { %v238_v19 = vsel %vm237_vm3, %v228_v16, 0  ;;  %v240_v20 = vsel %vm237_vm3, %v229_v18, 0  ;;  %645 = vst [vmem:[#allocation1] ss:$2 sm:$0xff] %v1605_v15  ;;  %v270_v27 = vsub.f32 %v1600_v13, %v1613_v21  ;;  %p1328_p9 = pnand %p1327_p7, %p1543_p13  ;;  %p1333_p0 = por %p1332_p12, %p1331_p11 }
  0x44   : > { %v257_v22 = vand.u32 4294901760, %v238_v19  ;;  %v1615_v23 = vand.u32 4294901760, %v262_v17  ;;  %v434_v24 = vand.u32 4294901760, %v240_v20 }
  0x45   : > { %v1625_v34 = vand.u32 4294901760, %v270_v27  ;;  %607 = vperm.xlu0 %1279, %v224_v41   ;;  %p1329_p10 = pneg %p1328_p9 }
  0x46   : > { %258 = vmatpush.msra.mxu0 %v257_v22  ;;  %v292_v25 = vsub.f32 %v238_v19, %v257_v22  ;;  %351 = vmatpush.msra.mxu3 %v257_v22  ;;  %v469_v26 = vsub.f32 %v240_v20, %v434_v24 }
  0x47   : > { %264 = vmatmul.f32.vlgmr.msra.gmra.mxu0 %v1615_v23  ;;  %355 = vmatmul.f32.vlgmr.msra.gmra.mxu3 %v1603_v14  ;;  %p1334_p1 = pnand %p1333_p0, %p1329_p10 }
  0x48   : > { %323 = vmatpush.msra.mxu2 %v292_v25  ;;  %v293_v28 = vand.u32 4294901760, %v292_v25  ;;  %v470_v29 = vand.u32 4294901760, %v469_v26 }
  0x49   : > { %326 = vmatmul.f32.vlgmr.msra.gmra.mxu2 %v1597_v12 }
  0x4a   : > { %435 = vmatpush.msrb.mxu2 %v434_v24  ;;  %v294_v30 = vsub.f32 %v292_v25, %v293_v28  ;;  %383 = vmatpush.msrb.mxu0 %v293_v28  ;;  %v471_v31 = vsub.f32 %v469_v26, %v470_v29  ;;  %v646_v32 = vld.sshfl [vmem:[#allocation1] sm:$0xff pattern:$0x75316420]  ;;  %v647_v44 = vld.sshfl [vmem:[#allocation1 + $0x8] sm:$0xff pattern:$0x75316420] }
  0x4b   : > { %v648_v35 = vsel %vm237_vm3, %v646_v32, 0  ;;  %v650_v45 = vsel %vm237_vm3, %v647_v44, 0 }
  0x4c   : > { %560 = vmatpush.msra.mxu2 %v470_v29  ;;  %500 = vmatpush.msra.mxu0 %v469_v26  ;;  %v295_v36 = vand.u32 4294901760, %v294_v30  ;;  %v472_v37 = vand.u32 4294901760, %v471_v31  ;;  %v667_v38 = vand.u32 4294901760, %v648_v35  ;;  %v844_v46 = vand.u32 4294901760, %v650_v45 }
  0x4e   : > { %296 = vmatpush.msra.mxu1 %v295_v36  ;;  %473 = vmatpush.msrb.mxu3 %v472_v37  ;;  %v702_v40 = vsub.f32 %v648_v35, %v667_v38  ;;  %v879_v48 = vsub.f32 %v650_v45, %v844_v46  ;;  %v624_v37 = vperm.slane %v1583_v5, 2 }
  0x4f   : > { %272 = vmatmul.f32.gmra.mxu0 %v1625_v34  ;;  %298 = vmatmul.f32.vlgmr.msra.gmra.mxu1 %v1592_v9 }
  0x50   : > { %409 = vmatpush.msrb.mxu1 %v257_v22  ;;  %361 = vmatmul.f32.gmra.mxu3 %v1613_v21  ;;  %v703_v42 = vand.u32 4294901760, %v702_v40  ;;  %v880_v49 = vand.u32 4294901760, %v879_v48 }
  0x51   : > { %331 = vmatmul.f32.gmra.mxu2 %v1600_v13  ;;  %586 = vmatpush.msra.mxu3 %v434_v24 }
  0x52   : > { %528 = vmatpush.msra.mxu1 %v434_v24  ;;  %v704_v43 = vsub.f32 %v702_v40, %v703_v42  ;;  %v881_v50 = vsub.f32 %v879_v48, %v880_v49 }
  0x54   : > { %v705_v47 = vand.u32 4294901760, %v704_v43  ;;  %v882_v51 = vand.u32 4294901760, %v881_v50 }
  0x57   : > { %302 = vmatmul.f32.gmra.mxu1 %v1594_v11  ;;  %385 = vmatmul.f32.vlgmr.msrb.gmra.mxu0 %v1592_v9 }
  0x58   : > { %475 = vmatmul.f32.vlgmr.msrb.gmra.mxu3 %v1592_v9  ;;  %668 = vmatpush.msrb.mxu0 %v667_v38 }
  0x59   : > { %441 = vmatmul.f32.vlgmr.msrb.gmra.mxu2 %v1615_v23  ;;  %761 = vmatpush.msrb.mxu3 %v667_v38 }
  0x5a   : > { %733 = vmatpush.msrb.mxu2 %v702_v40 }
  0x5f   : > { %389 = vmatmul.f32.gmra.mxu0 %v1594_v11  ;;  %411 = vmatmul.f32.vlgmr.msrb.gmra.mxu1 %v1592_v9 }
  0x60   : > { %479 = vmatmul.f32.gmra.mxu3 %v1594_v11  ;;  %706 = vmatpush.msrb.mxu1 %v705_v47 }
  0x61   : > { %449 = vmatmul.f32.gmra.mxu2 %v1625_v34 }
  0x67   : > { %415 = vmatmul.f32.gmra.mxu1 %v1594_v11  ;;  %503 = vmatmul.f32.vlgmr.msra.gmra.mxu0 %v1597_v12 }
  0x68   : > { %588 = vmatmul.f32.vlgmr.msra.gmra.mxu3 %v1592_v9  ;;  %793 = vmatpush.msra.mxu0 %v703_v42  ;;  %v628_v42 = vperm.slane %v624_v37, 2 }
  0x69   : > { %562 = vmatmul.f32.vlgmr.msra.gmra.mxu2 %v1592_v9  ;;  %883 = vmatpush.msra.mxu3 %v882_v51 }
  0x6a   : > { %845 = vmatpush.msra.mxu2 %v844_v46 }
  0x6f   : > { %508 = vmatmul.f32.gmra.mxu0 %v1600_v13  ;;  %532 = vmatmul.f32.vlgmr.msra.gmra.mxu1 %v1603_v14 }
  0x70   : > { %592 = vmatmul.f32.gmra.mxu3 %v1594_v11  ;;  %819 = vmatpush.msra.mxu1 %v667_v38 }
  0x71   : > { %566 = vmatmul.f32.gmra.mxu2 %v1594_v11 }
  0x77   : > { %538 = vmatmul.f32.gmra.mxu1 %v1613_v21  ;;  %674 = vmatmul.f32.vlgmr.msrb.gmra.mxu0 %v1615_v23 }
  0x78   : > { %765 = vmatmul.f32.vlgmr.msrb.gmra.mxu3 %v1603_v14  ;;  %910 = vmatpush.msrb.mxu0 %v879_v48 }
  0x79   : > { %736 = vmatmul.f32.vlgmr.msrb.gmra.mxu2 %v1597_v12  ;;  %996 = vmatpush.msrb.mxu3 %v844_v46 }
  0x7a   : > { %970 = vmatpush.msrb.mxu2 %v880_v49 }
  0x7f   : > { %682 = vmatmul.f32.gmra.mxu0 %v1625_v34  ;;  %708 = vmatmul.f32.vlgmr.msrb.gmra.mxu1 %v1592_v9 }
  0x80   : > { %771 = vmatmul.f32.gmra.mxu3 %v1613_v21  ;;  %938 = vmatpush.msrb.mxu1 %v844_v46  ;;  %v629_v46 = vperm.slane %v625_v39, 2  ;;  %v1024_v39 = vperm.slane %v1605_v15, 2 }
  0x81   : > { %741 = vmatmul.f32.gmra.mxu2 %v1600_v13 }
  0x87   : > { %712 = vmatmul.f32.gmra.mxu1 %v1594_v11  ;;  %795 = vmatmul.f32.vlgmr.msra.gmra.mxu0 %v1592_v9 }
  0x88   : > { %885 = vmatmul.f32.vlgmr.msra.gmra.mxu3 %v1592_v9 }
  0x89   : > { %851 = vmatmul.f32.vlgmr.msra.gmra.mxu2 %v1615_v23 }
  0x8f   : > { %799 = vmatmul.f32.gmra.mxu0 %v1594_v11  ;;  %821 = vmatmul.f32.vlgmr.msra.gmra.mxu1 %v1592_v9 }
  0x90   : > { %889 = vmatmul.f32.gmra.mxu3 %v1594_v11 }
  0x91   : > { %859 = vmatmul.f32.gmra.mxu2 %v1625_v34 }
  0x97   : > { %825 = vmatmul.f32.gmra.mxu1 %v1594_v11  ;;  %913 = vmatmul.f32.vlgmr.msrb.gmra.mxu0 %v1597_v12 }
  0x98   : > { %998 = vmatmul.f32.vlgmr.msrb.gmra.mxu3 %v1592_v9 }
  0x99   : > { %972 = vmatmul.f32.vlgmr.msrb.gmra.mxu2 %v1592_v9 }
  0x9f   : > { %918 = vmatmul.f32.gmra.mxu0 %v1600_v13  ;;  %942 = vmatmul.f32.vlgmr.msrb.gmra.mxu1 %v1603_v14 }
  0xa0   : > { %1002 = vmatmul.f32.gmra.mxu3 %v1594_v11 }
  0xa1   : > { %976 = vmatmul.f32.gmra.mxu2 %v1594_v11 }
  0xa7   : > { %948 = vmatmul.f32.gmra.mxu1 %v1613_v21 }
  0xaf   : > { %v1677_v11 = vpop.permute.xlu0 %602 }
  0xb7   : > { %v1679_v32 = vpop.permute.xlu0 %607 }
  0xc4   : > { %v265_v52 = vpop.f32.mrf.mxu0 }
  0xca   : > { %v356_v53 = vpop.f32.mrf.mxu3 }
  0xcc   : > { %v273_v54 = vpop.f32.mrf.mxu0  ;;  %v299_v55 = vpop.f32.mrf.mxu1 }
  0xcd   : > { %v327_v56 = vpop.f32.mrf.mxu2  ;;  %v300_v7 = vadd.f32 %v299_v55, %v265_v52 }
  0xcf   : > { %v328_v10 = vadd.f32 %v327_v56, %v300_v7 }
  0xd1   : > { %v357_v20 = vadd.f32 %v356_v53, %v328_v10  ;;  %v1436_v53 = vmov 0.0  }
  0xd3   : > { %v362_v57 = vpop.f32.mrf.mxu3 }
  0xd4   : > { %v303_v58 = vpop.f32.mrf.mxu1  ;;  %v386_v59 = vpop.f32.mrf.mxu0 }
  0xd5   : > { %v332_v60 = vpop.f32.mrf.mxu2  ;;  %v304_v2 = vadd.f32 %v303_v58, %v273_v54  ;;  %v387_v22 = vadd.f32 %v386_v59, %v357_v20 }
  0xd7   : > { %v333_v8 = vadd.f32 %v332_v60, %v304_v2 }
  0xd9   : > { %v363_v14 = vadd.f32 %v362_v57, %v333_v8 }
  0xdb   : > { %v476_v61 = vpop.f32.mrf.mxu3 }
  0xdc   : > { %v390_v62 = vpop.f32.mrf.mxu0  ;;  %v412_v63 = vpop.f32.mrf.mxu1 }
  0xdd   : > { %v442_v0 = vpop.f32.mrf.mxu2  ;;  %v391_v21 = vadd.f32 %v390_v62, %v363_v14  ;;  %v413_v26 = vadd.f32 %v412_v63, %v387_v22 }
  0xde   : > { %v477_v9 = vadd.f32 %v476_v61, %v442_v0 }
  0xdf   : > { %v596_v36 = vand.u32 2147483647, %v413_v26 }
  0xe1   : > { %vm610_vm5 = vcmp.lt.f32.partialorder %v596_v36, %v1677_v11 }
  0xe3   : > { %v480_v1 = vpop.f32.mrf.mxu3 }
  0xe4   : > { %v416_v3 = vpop.f32.mrf.mxu1  ;;  %v504_v4 = vpop.f32.mrf.mxu0 }
  0xe5   : > { %v450_v6 = vpop.f32.mrf.mxu2  ;;  %v505_v12 = vadd.f32 %v504_v4, %v477_v9  ;;  %v417_v23 = vadd.f32 %v416_v3, %v391_v21 }
  0xe6   : > { %v481_v24 = vadd.f32 %v480_v1, %v450_v6 }
  0xe7   : > { %v598_v29 = vand.u32 2147483647, %v417_v23 }
  0xe9   : > { %vm612_vm4 = vcmp.lt.f32.partialorder %v598_v29, %v1679_v32 }
  0xea   : > { %vm1685_vm6 = vmand %vm610_vm5, %vm612_vm4 }
  0xeb   : > { %v589_v13 = vpop.f32.mrf.mxu3  ;;  %v636_v49 = vsel %vm1685_vm6, %v628_v42, 1000.0  ;;  %v630_v50 = vsel %vm1685_vm6, %v628_v42, -1000.0  ;;  %v1164_v54 = vsel %vm1685_vm6, 1.0, %v1436_v53 }
  0xec   : > { %v509_v16 = vpop.f32.mrf.mxu0  ;;  %v533_v17 = vpop.f32.mrf.mxu1 }
  0xed   : > { %v534_v18 = vadd.f32 %v533_v17, %v505_v12  ;;  %v563_v19 = vpop.f32.mrf.mxu2  ;;  %v510_v27 = vadd.f32 %v509_v16, %v481_v24 }
  0xef   : > { %v564_v25 = vadd.f32 %v563_v19, %v534_v18 }
  0xf1   : > { %v590_v33 = vadd.f32 %v589_v13, %v564_v25 }
  0xf3   : > { %v593_v28 = vpop.f32.mrf.mxu3  ;;  %v597_v40 = vand.u32 2147483647, %v590_v33 }
  0xf4   : > { %v539_v30 = vpop.f32.mrf.mxu1  ;;  %v675_v31 = vpop.f32.mrf.mxu0 }
  0xf5   : > { %v540_v34 = vadd.f32 %v539_v30, %v510_v27  ;;  %v567_v35 = vpop.f32.mrf.mxu2  ;;  %vm611_vm7 = vcmp.lt.f32.partialorder %v597_v40, %v1677_v11  ;;  %v1025_v40 = vperm.slane %v1605_v15, 6 }
  0xf7   : > { %v568_v38 = vadd.f32 %v567_v35, %v540_v34  ;;  %v1029_v45 = vperm.slane %v1025_v40, 2 }
  0xf9   : > { %v594_v41 = vadd.f32 %v593_v28, %v568_v38 }
  0xfb   : > { %v599_v43 = vand.u32 2147483647, %v594_v41  ;;  %v766_v44 = vpop.f32.mrf.mxu3 }
  0xfc   : > { %v683_v47 = vpop.f32.mrf.mxu0  ;;  %v709_v48 = vpop.f32.mrf.mxu1 }
  0xfd   : > { %vm613_vm8 = vcmp.lt.f32.partialorder %v599_v43, %v1679_v32  ;;  %v737_v5 = vpop.f32.mrf.mxu2  ;;  %v710_v9 = vadd.f32 %v709_v48, %v675_v31 }
  0xfe   : > { %vm615_vm9 = vmand %vm611_vm7, %vm613_vm8 }
  0xff   : > { %v637_v51 = vsel %vm615_vm9, %v629_v46, 1000.0  ;;  %v631_v52 = vsel %vm615_vm9, %v629_v46, -1000.0  ;;  %v1165_v55 = vsel %vm615_vm9, 1.0, %v1436_v53  ;;  %v738_v13 = vadd.f32 %v737_v5, %v710_v9 }
 0x100   : > { %v638_v56 = vmin.f32 %v636_v49, %v637_v51  ;;  %v632_v57 = vmax.f32 %v630_v50, %v631_v52  ;;  %v620_v58 = vadd.f32 %v1165_v55, %v1164_v54  ;;  %v1042_v54 = vld [vmem:[%s1579_s25] sm:$0xff] }
 0x101   : > { %v767_v21 = vadd.f32 %v766_v44, %v738_v13  ;;  %v1028_v44 = vperm.slane %v1024_v39, 2 }
 0x102   : > { %639 = vmin.xlane.f32.xlu0 %v638_v56  ;;  %633 = vmax.xlane.f32.xlu2 %v632_v57 }
 0x103   : > { %621 = vadd.xlane.f32.xlu1 %v620_v58  ;;  %v772_v59 = vpop.f32.mrf.mxu3 }
 0x104   : > { %v713_v60 = vpop.f32.mrf.mxu1  ;;  %v796_v61 = vpop.f32.mrf.mxu0 }
 0x105   : > { %v742_v62 = vpop.f32.mrf.mxu2  ;;  %v714_v6 = vadd.f32 %v713_v60, %v683_v47  ;;  %v797_v24 = vadd.f32 %v796_v61, %v767_v21 }
 0x107   : > { %v743_v10 = vadd.f32 %v742_v62, %v714_v6 }
 0x109   : > { %v773_v18 = vadd.f32 %v772_v59, %v743_v10 }
 0x10b   : > { %v886_v63 = vpop.f32.mrf.mxu3 }
 0x10c   : > { %v800_v0 = vpop.f32.mrf.mxu0  ;;  %v822_v1 = vpop.f32.mrf.mxu1 }
 0x10d   : > { %v852_v2 = vpop.f32.mrf.mxu2  ;;  %v801_v22 = vadd.f32 %v800_v0, %v773_v18  ;;  %v823_v28 = vadd.f32 %v822_v1, %v797_v24 }
 0x10e   : > { %v887_v12 = vadd.f32 %v886_v63, %v852_v2 }
 0x10f   : > { %v1006_v37 = vand.u32 2147483647, %v823_v28 }
 0x111   : > { %vm1010_vm11 = vcmp.lt.f32.partialorder %v1006_v37, %v1677_v11 }
 0x113   : > { %v890_v4 = vpop.f32.mrf.mxu3 }
 0x114   : > { %v826_v3 = vpop.f32.mrf.mxu1  ;;  %v914_v8 = vpop.f32.mrf.mxu0 }
 0x115   : > { %v860_v7 = vpop.f32.mrf.mxu2  ;;  %v915_v14 = vadd.f32 %v914_v8, %v887_v12  ;;  %v827_v25 = vadd.f32 %v826_v3, %v801_v22 }
 0x116   : > { %v891_v26 = vadd.f32 %v890_v4, %v860_v7 }
 0x117   : > { %v1008_v31 = vand.u32 2147483647, %v827_v25 }
 0x119   : > { %vm1012_vm10 = vcmp.lt.f32.partialorder %v1008_v31, %v1679_v32 }
 0x11a   : > { %vm1014_vm12 = vmand %vm1010_vm11, %vm1012_vm10 }
 0x11b   : > { %v999_v17 = vpop.f32.mrf.mxu3  ;;  %v1030_v46 = vsel %vm1014_vm12, %v1028_v44, -1000.0  ;;  %v1167_v15 = vsel %vm1014_vm12, 1.0, %v1436_v53  ;;  %v1036_v51 = vsel %vm1014_vm12, %v1028_v44, 1000.0 }
 0x11c   : > { %v943_v16 = vpop.f32.mrf.mxu1  ;;  %v919_v23 = vpop.f32.mrf.mxu0 }
 0x11d   : > { %v944_v19 = vadd.f32 %v943_v16, %v915_v14  ;;  %v973_v20 = vpop.f32.mrf.mxu2  ;;  %v920_v29 = vadd.f32 %v919_v23, %v891_v26 }
 0x11f   : > { %v974_v27 = vadd.f32 %v973_v20, %v944_v19 }
 0x121   : > { %v1000_v33 = vadd.f32 %v999_v17, %v974_v27 }
 0x123   : > { %v1003_v36 = vpop.f32.mrf.mxu3  ;;  %v1007_v41 = vand.u32 2147483647, %v1000_v33 }
 0x124   : > { %v949_v30 = vpop.f32.mrf.mxu1 }
 0x125   : > { %v950_v34 = vadd.f32 %v949_v30, %v920_v29  ;;  %v977_v35 = vpop.f32.mrf.mxu2  ;;  %vm1011_vm13 = vcmp.lt.f32.partialorder %v1007_v41, %v1677_v11 }
 0x127   : > { %v978_v38 = vadd.f32 %v977_v35, %v950_v34 }
 0x129   : > { %v1004_v42 = vadd.f32 %v1003_v36, %v978_v38 }
 0x12b   : > { %v1009_v43 = vand.u32 2147483647, %v1004_v42 }
 0x12d   : > { %vm1013_vm14 = vcmp.lt.f32.partialorder %v1009_v43, %v1679_v32 }
 0x12e   : > { %vm1015_vm15 = vmand %vm1011_vm13, %vm1013_vm14 }
 0x12f   : > { %v1031_v47 = vsel %vm1015_vm15, %v1029_v45, -1000.0  ;;  %v1168_v48 = vsel %vm1015_vm15, 1.0, %v1436_v53  ;;  %v1037_v50 = vsel %vm1015_vm15, %v1029_v45, 1000.0 }
 0x130   : > { %v1032_v5 = vmax.f32 %v1030_v46, %v1031_v47  ;;  %v1020_v49 = vadd.f32 %v1168_v48, %v1167_v15  ;;  %v1038_v52 = vmin.f32 %v1036_v51, %v1037_v50 }
 0x132   : > { %1033 = vmax.xlane.f32.xlu2 %v1032_v5  ;;  %1021 = vadd.xlane.f32.xlu1 %v1020_v49 }
 0x13a   : > { %1039 = vmin.xlane.f32.xlu1 %v1038_v52 }
 0x175   : > { %v634_v32 = vpop.xlane.xlu2 %633  ;;  %v640_v62 = vpop.xlane.xlu0 %639 }
 0x176   : > { %v622_v11 = vpop.xlane.xlu1 %621  ;;  %v635_v58 = vmax.f32 %v634_v32, -1000.0  ;;  %v641_v0 = vmin.f32 %v640_v62, 1000.0 }
 0x1a5   : > { %v1022_v55 = vpop.xlane.xlu1 %1021  ;;  %v1034_v57 = vpop.xlane.xlu2 %1033 }
 0x1a6   : > { %v1023_v56 = vadd.f32 %v1022_v55, %v622_v11  ;;  %v1035_v59 = vmax.f32 %v635_v58, %v1034_v57 }
 0x1a8   : > { %v1043_v53 = vadd.f32 %v1042_v54, %v1023_v56 }
 0x1aa   : > { %1045 = vst.msk [vmem:[%s1579_s25] sm:$0xff] %vm1044_vm0, %v1043_v53 }
 0x1ad   : > { %v1040_v63 = vpop.xlane.xlu1 %1039 }
 0x1ae   : > { %v1041_v1 = vmin.f32 %v641_v0, %v1040_v63 }
 0x1b1   : > { %v1046_v60 = vld [vmem:[%s1579_s25] sm:$0xff] }
 0x1b2   : > { %v1047_v61 = vmax.f32 %v1046_v60, %v1035_v59 }
 0x1b4   : > { %1049 = vst.msk [vmem:[%s1579_s25] sm:$0xff] %vm1048_vm1, %v1047_v61 }
 0x1bb   : > { %v1050_v2 = vld [vmem:[%s1579_s25] sm:$0xff] }
 0x1bc   : > { %v1051_v3 = vmin.f32 %v1050_v2, %v1041_v1 }
 0x1be   : > { %1053 = vst.msk [vmem:[%s1579_s25] sm:$0xff] %vm1052_vm2, %v1051_v3 }
 0x1bf   : > { %1337 = shalt.err (!%p1334_p1)
}
 0x1c0   : > { %1176 = dma.vmem_to_hbm [thread:$0]  (%p1543_p13), %s1068_s21, 128, %s1070_s4, %s1055_s19  }
 0x1c1 PF: > { %p1187_p3 = scmp.ge.s32.totalorder %s1432_s22, 2  ;;  %s1081_s30 = sand.u32 1, %s1392_s12  }
 0x1c2   : > { %s1082_s25 = scalar_lea.sflag [#allocation4], %s1081_s30 }
 0x1c3   : > { %p1183_p4 = pnand %p1187_p3, %p1557_p2 }
 0x1c5   : > { %p1184_p6 = pneg %p1183_p4 }
 0x1c7   : > { %1387 = dma.done.wait (%p1184_p6), %s1082_s25, 128  }
 0x1c8   : > { %1389 = vsyncadd (%p1184_p6), %s1082_s25, 4294967168  ;;  %s19_s22 = sadd.s32 1, %s1432_s22   ;;  %s1783_s10 = smov %s1551_s15 }
 0x1c9   : > { %p16_p8 = scmp.ge.s32.totalorder %s19_s22, 8   ;;  %s1784_s19 = sld [smem:[#allocation8_spill]] }
 0x1ca   : > { %s1785_s28 = sld [smem:[#allocation9_spill]]  ;;  %s1787_s12 = smov %s1396_s13 }
 0x1cb   : > { %s1786_s21 = sld [smem:[#allocation10_spill]]  ;;  %s1788_s13 = smov %s1400_s14 }
 0x1cc   : > { %s1789_s14 = smov %s1548_s11  ;;  %s1790_s15 = smov %s1408_s16 }
 0x1cd   : > { %s1791_s16 = smov %s1412_s17  ;;  %s1792_s17 = smov %s1783_s10 }
 0x1ce   : > { %s1793_s18 = smov %s1424_s20  ;;  %18 = sbr.rel (!%p16_p8) target bundleno = 9 (0x9), region = 82 }
 0x1d0   : > { %s1794_s20 = smov %s1785_s28 }
 0x1d3   :  { %1088 = vsyncpa [#allocation3], 1 }
 0x1d4   :  { %1090 = vsyncpa [#allocation3 + $0x1], 1 }
 0x1d5   :  { %1091 = vsyncpa [#allocation4], 1 }
 0x1d6   :  { %1093 = vsyncpa [#allocation4 + $0x1], 1 }

</bundles_post_ra>
